<compile_context>
chip_gen: v7x
topology: tpu7x:2x2x1
jax: 0.10.0
libtpu: 0.0.40
codegen_flags: <defaults>
</compile_context>

<pallas_src>
import functools

import jax
import jax.numpy as jnp
from jax import lax
from jax.experimental import pallas as pl
from jax.experimental.pallas import tpu as pltpu


_MIN_VMEM = 32 * 1024 * 1024          # never below the default scoped limit
_MAX_VMEM = 64 * 1024 * 1024          # stay honest on v7x (64 MiB physical)


# --------------------------- in-kernel helpers ---------------------------

def _layer_norm(x, gamma, beta, eps=1e-5):
    """LayerNorm over the last dim (f32 statistics), affine."""
    mean = jnp.mean(x, axis=-1, keepdims=True)
    xc = x - mean
    var = jnp.mean(xc * xc, axis=-1, keepdims=True)
    return xc * lax.rsqrt(var + eps) * gamma + beta


def _mha_core(q_bf, k_bf, v_bf, wo, bo, *, num_heads, head_dim):
    """Multi-head softmax(q k^T / sqrt(Dh)) v + ONE fused output projection.

    q_bf: (Bt, Sq, E) bf16; k_bf/v_bf: (Bt, Skv, E) bf16; wo: (E, E) bf16;
    bo: (1, E) f32.  Returns (Bt*Sq, E) f32.

    Per-head contexts are concatenated back into a lane-dense (rows, E) slab
    so the output projection contracts over K = E on the MXU instead of H
    small-K (Dh) matmuls.
    TODO(synk): whole-S score matrices kept in VMEM; a flash-style KV-tiled
    online-softmax variant is needed for S >~ 2k on v7x's 64 MiB VMEM.
    TODO(synk): head_dim < 128 lane slices imply masked loads; padding heads
    to 128 lanes would change the parameter layout, so keep as-is here.
    """
    Bt, Sq, E = q_bf.shape
    scale = 1.0 / (head_dim ** 0.5)
    ctx_heads = []
    for h in range(num_heads):
        sl = slice(h * head_dim, (h + 1) * head_dim)
        qh = q_bf[:, :, sl]
        kh = k_bf[:, :, sl]
        vh = v_bf[:, :, sl]
        s = jnp.einsum("bqd,bkd->bqk", qh, kh,
                       preferred_element_type=jnp.float32) * scale
        m = jnp.max(s, axis=-1, keepdims=True)
        p = jnp.exp(s - m)
        denom = jnp.sum(p, axis=-1, keepdims=True)
        p = p * pl.reciprocal(denom, approx=True)          # EUP slot, ~free
        ctx_heads.append(jnp.einsum("bqk,bkd->bqd", p.astype(jnp.bfloat16), vh,
                                    preferred_element_type=jnp.float32))
    ctx = jnp.concatenate(ctx_heads, axis=-1)              # (Bt, Sq, E) f32
    ctx2 = ctx.reshape(Bt * Sq, E).astype(jnp.bfloat16)
    return jnp.dot(ctx2, wo, preferred_element_type=jnp.float32) + bo


# --------------------------- fused layer kernels ---------------------------

def _encoder_layer_kernel(x_ref, wqkv_ref, bqkv_ref, wo_ref, bo_ref,
                          ln1g_ref, ln1b_ref, theta_ref, ln2g_ref, ln2b_ref,
                          o_ref, *, num_heads):
    Bt, S, E = x_ref.shape
    Dh = E // num_heads
    x_bf = x_ref[...].reshape(Bt * S, E)                   # bf16 activations

    qkv = jnp.dot(x_bf, wqkv_ref[...],
                  preferred_element_type=jnp.float32) + bqkv_ref[...]
    qkv_bf = qkv.astype(jnp.bfloat16).reshape(Bt, S, 3 * E)    # cast once
    attn = _mha_core(qkv_bf[:, :, :E], qkv_bf[:, :, E:2 * E], qkv_bf[:, :, 2 * E:],
                     wo_ref[...], bo_ref[...],
                     num_heads=num_heads, head_dim=Dh)      # (Bt*S, E) f32
    x1 = _layer_norm(attn + x_bf.astype(jnp.float32),
                     ln1g_ref[...], ln1b_ref[...])

    # Classical surrogate of the PennyLane quantum feed-forward:
    # <Z_j> ~= cos(x_j + sum_l theta[l, j]); theta pre-summed in the wrapper.
    # TODO(synk): entangling (CNOT) gates of the quantum circuit have no
    # Pallas equivalent; a product-state single-qubit-rotation model is used.
    ff = jnp.cos(x1 + theta_ref[...])
    y = _layer_norm(ff + x1, ln2g_ref[...], ln2b_ref[...])
    o_ref[...] = y.reshape(Bt, S, E).astype(o_ref.dtype)


def _decoder_layer_kernel(x_ref, enc_ref,
                          wqkv_ref, bqkv_ref, wo_s_ref, bo_s_ref,
                          ln1g_ref, ln1b_ref,
                          wq_c_ref, bq_c_ref, wkv_c_ref, bkv_c_ref,
                          wo_c_ref, bo_c_ref,
                          ln2g_ref, ln2b_ref,
                          theta_ref, ln3g_ref, ln3b_ref,
                          o_ref, *, num_heads):
    Bt, S, E = x_ref.shape
    Se = enc_ref.shape[1]
    Dh = E // num_heads
    x_bf = x_ref[...].reshape(Bt * S, E)                    # bf16
    enc_bf = enc_ref[...].reshape(Bt * Se, E)               # bf16

    # Self attention (unmasked, matching the reference module).
    # TODO(synk): add a causal mask here if the reference decoder is masked.
    qkv = jnp.dot(x_bf, wqkv_ref[...],
                  preferred_element_type=jnp.float32) + bqkv_ref[...]
    qkv_bf = qkv.astype(jnp.bfloat16).reshape(Bt, S, 3 * E)
    sa = _mha_core(qkv_bf[:, :, :E], qkv_bf[:, :, E:2 * E], qkv_bf[:, :, 2 * E:],
                   wo_s_ref[...], bo_s_ref[...],
                   num_heads=num_heads, head_dim=Dh)
    x1 = _layer_norm(sa + x_bf.astype(jnp.float32),
                     ln1g_ref[...], ln1b_ref[...])

    # Cross attention against the encoder output.
    x1_bf = x1.astype(jnp.bfloat16)
    qc = jnp.dot(x1_bf, wq_c_ref[...],
                 preferred_element_type=jnp.float32) + bq_c_ref[...]
    kv = jnp.dot(enc_bf, wkv_c_ref[...],
                 preferred_element_type=jnp.float32) + bkv_c_ref[...]
    qc_bf = qc.astype(jnp.bfloat16).reshape(Bt, S, E)
    kv_bf = kv.astype(jnp.bfloat16).reshape(Bt, Se, 2 * E)
    ca = _mha_core(qc_bf, kv_bf[:, :, :E], kv_bf[:, :, E:],
                   wo_c_ref[...], bo_c_ref[...],
                   num_heads=num_heads, head_dim=Dh)
    x2 = _layer_norm(ca + x1, ln2g_ref[...], ln2b_ref[...])

    ff = jnp.cos(x2 + theta_ref[...])
    y = _layer_norm(ff + x2, ln3g_ref[...], ln3b_ref[...])
    o_ref[...] = y.reshape(Bt, S, E).astype(o_ref.dtype)


def _out_proj_kernel(x_ref, w_ref, b_ref, o_ref):
    x = x_ref[...].astype(jnp.bfloat16)
    o_ref[...] = jnp.dot(x, w_ref[...],
                         preferred_element_type=jnp.float32) + b_ref[...]


# --------------------------- pallas_call wrappers ---------------------------

def _rep(shape):
    """Grid-invariant (weight) operand: constant index_map, single-buffered."""
    n = len(shape)

    def idx(b, _n=n):
        return (0,) * _n

    try:
        return pl.BlockSpec(shape, idx, pipeline_mode=pl.Buffered(1))
    except TypeError:            # older pallas without pipeline_mode kwarg
        return pl.BlockSpec(shape, idx)


def _pick_batch_block(B, S, target_rows=256):
    """Batch elements per grid step: fill the MXU M dim (~256 rows) but keep
    >= 2 grid programs when B > 1 so both v7x TensorCores have work."""
    bt = max(1, min(B, target_rows // max(S, 1)))
    while bt > 1 and (B % bt != 0 or B // bt < 2):
        bt -= 1
    return bt


def _layer_vmem_limit(Bt, S, Se, E, weights):
    """Rough per-program VMEM budget: activation slabs (double-buffered),
    single-buffered weights, and the in-kernel f32 intermediates."""
    rows = Bt * S
    weight_bytes = sum(int(w.size) * w.dtype.itemsize for w in weights)
    act_bytes = 2 * 2 * 2 * (rows * E + Bt * Se * E)        # x/out + enc, bf16, x2 buf
    inter_bytes = (rows * 3 * E * 6                         # qkv f32 + bf16
                   + 2 * Bt * S * max(S, Se) * 4            # scores + probs f32
                   + 4 * rows * E * 4)                      # ctx / x1 / x2 / ff f32
    est = 2 * (weight_bytes + act_bytes + inter_bytes)
    return int(min(max(est, _MIN_VMEM), _MAX_VMEM))


def encoder_layer(x, p, theta_sum, num_heads):
    B, S, E = x.shape
    Bt = _pick_batch_block(B, S)
    kernel = functools.partial(_encoder_layer_kernel, num_heads=num_heads)
    act = pl.BlockSpec((Bt, S, E), lambda b: (b, 0, 0))
    weights = [p["wqkv"], p["bqkv"], p["wo"], p["bo"],
               p["ln1_g"], p["ln1_b"], theta_sum, p["ln2_g"], p["ln2_b"]]
    return pl.pallas_call(
        kernel,
        out_shape=jax.ShapeDtypeStruct((B, S, E), jnp.bfloat16),
        grid=(B // Bt,),
        in_specs=[act] + [_rep(w.shape) for w in weights],
        out_specs=act,
        compiler_params=pltpu.CompilerParams(
            dimension_semantics=("parallel",),
            vmem_limit_bytes=_layer_vmem_limit(Bt, S, S, E, weights)),
    )(x, *weights)


def decoder_layer(x, enc, p, theta_sum, num_heads):
    B, S, E = x.shape
    Se = enc.shape[1]
    Bt = _pick_batch_block(B, S)
    kernel = functools.partial(_decoder_layer_kernel, num_heads=num_heads)
    act = pl.BlockSpec((Bt, S, E), lambda b: (b, 0, 0))
    act_e = pl.BlockSpec((Bt, Se, E), lambda b: (b, 0, 0))
    weights = [p["wqkv_s"], p["bqkv_s"], p["wo_s"], p["bo_s"],
               p["ln1_g"], p["ln1_b"],
               p["wq_c"], p["bq_c"], p["wkv_c"], p["bkv_c"],
               p["wo_c"], p["bo_c"],
               p["ln2_g"], p["ln2_b"],
               theta_sum, p["ln3_g"], p["ln3_b"]]
    return pl.pallas_call(
        kernel,
        out_shape=jax.ShapeDtypeStruct((B, S, E), jnp.bfloat16),
        grid=(B // Bt,),
        in_specs=[act, act_e] + [_rep(w.shape) for w in weights],
        out_specs=act,
        compiler_params=pltpu.CompilerParams(
            dimension_semantics=("parallel",),
            vmem_limit_bytes=_layer_vmem_limit(Bt, S, Se, E, weights)),
    )(x, enc, *weights)


def output_projection(x, w_bf16, b, *, tile_rows=512, tile_n=1024):
    """Final vocab projection: rows = B*S flattened, N tiled for large vocab."""
    B, S, E = x.shape
    N = w_bf16.shape[1]
    R = B * S
    x2 = x.reshape(R, E)

    TR = R if R <= tile_rows else tile_rows
    TN = N if N <= tile_n else tile_n
    Rp = ((R + TR - 1) // TR) * TR
    Np = ((N + TN - 1) // TN) * TN
    if Rp != R:
        x2 = jnp.pad(x2, ((0, Rp - R), (0, 0)))
    wp, bp = w_bf16, b
    if Np != N:
        wp = jnp.pad(wp, ((0, 0), (0, Np - N)))
        bp = jnp.pad(bp, (0, Np - N))

    out = pl.pallas_call(
        _out_proj_kernel,
        out_shape=jax.ShapeDtypeStruct((Rp, Np), jnp.float32),
        grid=(Rp // TR, Np // TN),
        in_specs=[
            pl.BlockSpec((TR, E), lambda i, j: (i, 0)),
            pl.BlockSpec((E, TN), lambda i, j: (0, j)),
            pl.BlockSpec((1, TN), lambda i, j: (0, j)),
        ],
        out_specs=pl.BlockSpec((TR, TN), lambda i, j: (i, j)),
        compiler_params=pltpu.CompilerParams(
            dimension_semantics=("parallel", "parallel")),
    )(x2, wp, bp.reshape(1, Np))
    return out[:R, :N].reshape(B, S, N)


# --------------------------- model glue (plain JAX) ---------------------------

def quantum_transformer_forward(params, src, tgt, num_heads):
    S_src = src.shape[1]
    S_tgt = tgt.shape[1]

    # TODO(synk): token-embedding gather stays in plain JAX (jnp.take); a
    # DMA-gather Pallas kernel is unnecessary at these sizes.
    def embed(tokens, seq_len):
        tok = jnp.take(params["tok_emb"], tokens, axis=0)            # (B, S, E)
        pos = params["pos_emb"][:seq_len][None, :, :]
        return (tok + pos).astype(jnp.bfloat16)   # dropout == identity (eval)

    enc_out = embed(src, S_src)
    for p in params["encoder_layers"]:
        theta = jnp.sum(p["q_weights"], axis=0).reshape(1, -1)       # hoisted
        enc_out = encoder_layer(enc_out, p, theta, num_heads)

    dec_out = embed(tgt, S_tgt)
    for p in params["decoder_layers"]:
        theta = jnp.sum(p["q_weights"], axis=0).reshape(1, -1)
        dec_out = decoder_layer(dec_out, enc_out, p, theta, num_heads)

    return output_projection(dec_out, params["out_w"], params["out_b"])


# --------------------------- deterministic init ---------------------------

def init_params(key, *, vocab_size, embed_len, num_layers, num_wires,
                num_encoder_layers, num_decoder_layers, max_seq):
    assert num_wires == embed_len, "quantum FF maps one wire per embedding dim"
    E = embed_len
    keys = iter(jax.random.split(key, 512))
    nxt = lambda: next(keys)

    def linear_p(fan_in, fan_out):
        bound = 1.0 / (fan_in ** 0.5)                                # nn.Linear default
        w = jax.random.uniform(nxt(), (fan_in, fan_out), jnp.float32, -bound, bound)
        b = jax.random.uniform(nxt(), (fan_out,), jnp.float32, -bound, bound)
        return w, b

    def fused_qkv():
        wq, bq = linear_p(E, E)
        wk, bk = linear_p(E, E)
        wv, bv = linear_p(E, E)
        w = jnp.concatenate([wq, wk, wv], axis=1).astype(jnp.bfloat16)
        b = jnp.concatenate([bq, bk, bv]).reshape(1, 3 * E)
        return w, b

    def fused_kv():
        wk, bk = linear_p(E, E)
        wv, bv = linear_p(E, E)
        w = jnp.concatenate([wk, wv], axis=1).astype(jnp.bfloat16)
        b = jnp.concatenate([bk, bv]).reshape(1, 2 * E)
        return w, b

    def proj():
        w, b = linear_p(E, E)
        return w.astype(jnp.bfloat16), b.reshape(1, E)

    def ln_p():
        return jnp.ones((1, E), jnp.float32), jnp.zeros((1, E), jnp.float32)

    def q_weights():
        return jax.random.uniform(nxt(), (num_layers, num_wires),
                                  jnp.float32, 0.0, 2.0 * jnp.pi)

    def enc_p():
        wqkv, bqkv = fused_qkv()
        wo, bo = proj()
        g1, b1 = ln_p()
        g2, b2 = ln_p()
        return dict(wqkv=wqkv, bqkv=bqkv, wo=wo, bo=bo,
                    ln1_g=g1, ln1_b=b1,
                    q_weights=q_weights(),
                    ln2_g=g2, ln2_b=b2)

    def dec_p():
        wqkv_s, bqkv_s = fused_qkv()
        wo_s, bo_s = proj()
        wq_c, bq_c = proj()
        wkv_c, bkv_c = fused_kv()
        wo_c, bo_c = proj()
        g1, b1 = ln_p()
        g2, b2 = ln_p()
        g3, b3 = ln_p()
        return dict(wqkv_s=wqkv_s, bqkv_s=bqkv_s, wo_s=wo_s, bo_s=bo_s,
                    ln1_g=g1, ln1_b=b1,
                    wq_c=wq_c, bq_c=bq_c, wkv_c=wkv_c, bkv_c=bkv_c,
                    wo_c=wo_c, bo_c=bo_c,
                    ln2_g=g2, ln2_b=b2,
                    q_weights=q_weights(),
                    ln3_g=g3, ln3_b=b3)

    out_w, out_b = linear_p(E, vocab_size)
    return dict(
        tok_emb=0.02 * jax.random.normal(nxt(), (vocab_size, E), jnp.float32),
        pos_emb=0.02 * jax.random.normal(nxt(), (max_seq, E), jnp.float32),
        encoder_layers=[enc_p() for _ in range(num_encoder_layers)],
        decoder_layers=[dec_p() for _ in range(num_decoder_layers)],
        out_w=out_w.astype(jnp.bfloat16), out_b=out_b,
    )


# --------------------------- demo ---------------------------

if __name__ == "__main__":
    B, S = 2, 8
    vocab_size = 32
    embed_len = 32
    num_heads = 4
    num_layers = 2            # quantum circuit depth
    num_wires = embed_len     # one wire per embedding dim
    num_encoder_layers = 1
    num_decoder_layers = 1

    key = jax.random.PRNGKey(0)
    pkey, skey, tkey = jax.random.split(key, 3)

    params = init_params(
        pkey,
        vocab_size=vocab_size,
        embed_len=embed_len,
        num_layers=num_layers,
        num_wires=num_wires,
        num_encoder_layers=num_encoder_layers,
        num_decoder_layers=num_decoder_layers,
        max_seq=S,
    )

    src = jax.random.randint(skey, (B, S), 0, vocab_size)
    tgt = jax.random.randint(tkey, (B, S), 0, vocab_size)

    logits = quantum_transformer_forward(params, src, tgt, num_heads)
    jax.block_until_ready(logits)

    assert logits.shape == (B, S, vocab_size), logits.shape
    assert logits.dtype == jnp.float32
    assert bool(jnp.all(jnp.isfinite(logits)))
    print("KERNEL_OK")
</pallas_src>

<mosaic_0001>
module attributes {stable_mosaic.version = 11 : i64} {
  func.func @_encoder_layer_kernel(%arg0: i32, %arg1: memref<1x8x32xbf16, #tpu.memory_space<vmem>>, %arg2: memref<32x96xbf16, #tpu.memory_space<vmem>>, %arg3: memref<1x96xf32, #tpu.memory_space<vmem>>, %arg4: memref<32x32xbf16, #tpu.memory_space<vmem>>, %arg5: memref<1x32xf32, #tpu.memory_space<vmem>>, %arg6: memref<1x32xf32, #tpu.memory_space<vmem>>, %arg7: memref<1x32xf32, #tpu.memory_space<vmem>>, %arg8: memref<1x32xf32, #tpu.memory_space<vmem>>, %arg9: memref<1x32xf32, #tpu.memory_space<vmem>>, %arg10: memref<1x32xf32, #tpu.memory_space<vmem>>, %arg11: memref<1x8x32xbf16, #tpu.memory_space<vmem>>) attributes {dimension_semantics = [#tpu.dimension_semantics<parallel>], iteration_bounds = array<i64: 2>, scalar_prefetch = 0 : i64, scratch_operands = 0 : i64, tpu.core_type = #tpu.core_type<tc>, window_params = [{transform_indices = @transform_0, window_bounds = array<i64: 1, 8, 32>}, {pipeline_mode = #tpu.pipeline_mode<synchronous>, transform_indices = @transform_1, window_bounds = array<i64: 32, 96>}, {pipeline_mode = #tpu.pipeline_mode<synchronous>, transform_indices = @transform_2, window_bounds = array<i64: 1, 96>}, {pipeline_mode = #tpu.pipeline_mode<synchronous>, transform_indices = @transform_3, window_bounds = array<i64: 32, 32>}, {pipeline_mode = #tpu.pipeline_mode<synchronous>, transform_indices = @transform_4, window_bounds = array<i64: 1, 32>}, {pipeline_mode = #tpu.pipeline_mode<synchronous>, transform_indices = @transform_5, window_bounds = array<i64: 1, 32>}, {pipeline_mode = #tpu.pipeline_mode<synchronous>, transform_indices = @transform_6, window_bounds = array<i64: 1, 32>}, {pipeline_mode = #tpu.pipeline_mode<synchronous>, transform_indices = @transform_7, window_bounds = array<i64: 1, 32>}, {pipeline_mode = #tpu.pipeline_mode<synchronous>, transform_indices = @transform_8, window_bounds = array<i64: 1, 32>}, {pipeline_mode = #tpu.pipeline_mode<synchronous>, transform_indices = @transform_9, window_bounds = array<i64: 1, 32>}, {transform_indices = @transform_10, window_bounds = array<i64: 1, 8, 32>}]} {
    %c0 = arith.constant 0 : index
    %c0_0 = arith.constant 0 : index
    %c0_1 = arith.constant 0 : index
    %0 = vector.load %arg1[%c0, %c0_0, %c0_1] : memref<1x8x32xbf16, #tpu.memory_space<vmem>>, vector<1x8x32xbf16>
    %1 = vector.shape_cast %0 : vector<1x8x32xbf16> to vector<8x32xbf16>
    %c0_2 = arith.constant 0 : index
    %c0_3 = arith.constant 0 : index
    %2 = vector.load %arg2[%c0_2, %c0_3] : memref<32x96xbf16, #tpu.memory_space<vmem>>, vector<32x96xbf16>
    %cst = arith.constant dense<0.000000e+00> : vector<8x96xf32>
    %3 = tpu.matmul %1, %2, %cst {dimension_numbers = #tpu.dot_dimension_numbers<[1], [0], [0], [1], [0, 0, 1, 1], [], []>} : vector<8x32xbf16>, vector<32x96xbf16>, vector<8x96xf32> -> vector<8x96xf32>
    %c0_4 = arith.constant 0 : index
    %c0_5 = arith.constant 0 : index
    %4 = vector.load %arg3[%c0_4, %c0_5] : memref<1x96xf32, #tpu.memory_space<vmem>>, vector<1x96xf32>
    %5 = vector.broadcast %4 : vector<1x96xf32> to vector<8x96xf32>
    %6 = arith.addf %3, %5 : vector<8x96xf32>
    %7 = arith.truncf %6 : vector<8x96xf32> to vector<8x96xbf16>
    %8 = vector.shape_cast %7 : vector<8x96xbf16> to vector<1x8x96xbf16>
    %9 = vector.extract_strided_slice %8 {offsets = [0, 0, 0], sizes = [1, 8, 32], strides = [1, 1, 1]} : vector<1x8x96xbf16> to vector<1x8x32xbf16>
    %10 = vector.extract_strided_slice %8 {offsets = [0, 0, 32], sizes = [1, 8, 32], strides = [1, 1, 1]} : vector<1x8x96xbf16> to vector<1x8x32xbf16>
    %11 = vector.extract_strided_slice %8 {offsets = [0, 0, 64], sizes = [1, 8, 32], strides = [1, 1, 1]} : vector<1x8x96xbf16> to vector<1x8x32xbf16>
    %c0_6 = arith.constant 0 : index
    %c0_7 = arith.constant 0 : index
    %12 = vector.load %arg4[%c0_6, %c0_7] : memref<32x32xbf16, #tpu.memory_space<vmem>>, vector<32x32xbf16>
    %c0_8 = arith.constant 0 : index
    %c0_9 = arith.constant 0 : index
    %13 = vector.load %arg5[%c0_8, %c0_9] : memref<1x32xf32, #tpu.memory_space<vmem>>, vector<1x32xf32>
    %14 = vector.extract_strided_slice %9 {offsets = [0, 0, 0], sizes = [1, 8, 8], strides = [1, 1, 1]} : vector<1x8x32xbf16> to vector<1x8x8xbf16>
    %15 = vector.extract_strided_slice %10 {offsets = [0, 0, 0], sizes = [1, 8, 8], strides = [1, 1, 1]} : vector<1x8x32xbf16> to vector<1x8x8xbf16>
    %16 = vector.extract_strided_slice %11 {offsets = [0, 0, 0], sizes = [1, 8, 8], strides = [1, 1, 1]} : vector<1x8x32xbf16> to vector<1x8x8xbf16>
    "tpu.trace_start"() <{level = 10 : i32, message = "bqd,bkd->bqk"}> : () -> ()
    %cst_10 = arith.constant dense<0.000000e+00> : vector<1x8x8xf32>
    %17 = tpu.matmul %14, %15, %cst_10 {dimension_numbers = #tpu.dot_dimension_numbers<[2], [2], [1], [1], [0, 0, 0, 1, 1, 1], [0], [0]>} : vector<1x8x8xbf16>, vector<1x8x8xbf16>, vector<1x8x8xf32> -> vector<1x8x8xf32>
    "tpu.trace_stop"() : () -> ()
    %cst_11 = arith.constant 0.353553385 : f32
    %18 = vector.broadcast %cst_11 : f32 to vector<1x8x8xf32>
    %19 = arith.mulf %17, %18 : vector<1x8x8xf32>
    %cst_12 = arith.constant dense<0xFF800000> : vector<1x8xf32>
    %20 = vector.multi_reduction <maximumf>, %19, %cst_12 [2] : vector<1x8x8xf32> to vector<1x8xf32>
    %21 = vector.shape_cast %20 : vector<1x8xf32> to vector<1x8x1xf32>
    %22 = vector.broadcast %21 : vector<1x8x1xf32> to vector<1x8x8xf32>
    %23 = arith.subf %19, %22 : vector<1x8x8xf32>
    %24 = math.exp %23 : vector<1x8x8xf32>
    %cst_13 = arith.constant dense<0.000000e+00> : vector<1x8xf32>
    %25 = vector.multi_reduction <add>, %24, %cst_13 [2] : vector<1x8x8xf32> to vector<1x8xf32>
    %26 = vector.shape_cast %25 : vector<1x8xf32> to vector<1x8x1xf32>
    %27 = tpu.reciprocal %26 {approx = true} : vector<1x8x1xf32> -> vector<1x8x1xf32>
    %28 = vector.broadcast %27 : vector<1x8x1xf32> to vector<1x8x8xf32>
    %29 = arith.mulf %24, %28 : vector<1x8x8xf32>
    %30 = arith.truncf %29 : vector<1x8x8xf32> to vector<1x8x8xbf16>
    "tpu.trace_start"() <{level = 10 : i32, message = "bqk,bkd->bqd"}> : () -> ()
    %cst_14 = arith.constant dense<0.000000e+00> : vector<1x8x8xf32>
    %31 = tpu.matmul %30, %16, %cst_14 {dimension_numbers = #tpu.dot_dimension_numbers<[2], [1], [1], [2], [0, 0, 0, 1, 1, 2], [0], [0]>} : vector<1x8x8xbf16>, vector<1x8x8xbf16>, vector<1x8x8xf32> -> vector<1x8x8xf32>
    "tpu.trace_stop"() : () -> ()
    %32 = vector.extract_strided_slice %9 {offsets = [0, 0, 8], sizes = [1, 8, 8], strides = [1, 1, 1]} : vector<1x8x32xbf16> to vector<1x8x8xbf16>
    %33 = vector.extract_strided_slice %10 {offsets = [0, 0, 8], sizes = [1, 8, 8], strides = [1, 1, 1]} : vector<1x8x32xbf16> to vector<1x8x8xbf16>
    %34 = vector.extract_strided_slice %11 {offsets = [0, 0, 8], sizes = [1, 8, 8], strides = [1, 1, 1]} : vector<1x8x32xbf16> to vector<1x8x8xbf16>
    "tpu.trace_start"() <{level = 10 : i32, message = "bqd,bkd->bqk"}> : () -> ()
    %cst_15 = arith.constant dense<0.000000e+00> : vector<1x8x8xf32>
    %35 = tpu.matmul %32, %33, %cst_15 {dimension_numbers = #tpu.dot_dimension_numbers<[2], [2], [1], [1], [0, 0, 0, 1, 1, 1], [0], [0]>} : vector<1x8x8xbf16>, vector<1x8x8xbf16>, vector<1x8x8xf32> -> vector<1x8x8xf32>
    "tpu.trace_stop"() : () -> ()
    %cst_16 = arith.constant 0.353553385 : f32
    %36 = vector.broadcast %cst_16 : f32 to vector<1x8x8xf32>
    %37 = arith.mulf %35, %36 : vector<1x8x8xf32>
    %cst_17 = arith.constant dense<0xFF800000> : vector<1x8xf32>
    %38 = vector.multi_reduction <maximumf>, %37, %cst_17 [2] : vector<1x8x8xf32> to vector<1x8xf32>
    %39 = vector.shape_cast %38 : vector<1x8xf32> to vector<1x8x1xf32>
    %40 = vector.broadcast %39 : vector<1x8x1xf32> to vector<1x8x8xf32>
    %41 = arith.subf %37, %40 : vector<1x8x8xf32>
    %42 = math.exp %41 : vector<1x8x8xf32>
    %cst_18 = arith.constant dense<0.000000e+00> : vector<1x8xf32>
    %43 = vector.multi_reduction <add>, %42, %cst_18 [2] : vector<1x8x8xf32> to vector<1x8xf32>
    %44 = vector.shape_cast %43 : vector<1x8xf32> to vector<1x8x1xf32>
    %45 = tpu.reciprocal %44 {approx = true} : vector<1x8x1xf32> -> vector<1x8x1xf32>
    %46 = vector.broadcast %45 : vector<1x8x1xf32> to vector<1x8x8xf32>
    %47 = arith.mulf %42, %46 : vector<1x8x8xf32>
    %48 = arith.truncf %47 : vector<1x8x8xf32> to vector<1x8x8xbf16>
    "tpu.trace_start"() <{level = 10 : i32, message = "bqk,bkd->bqd"}> : () -> ()
    %cst_19 = arith.constant dense<0.000000e+00> : vector<1x8x8xf32>
    %49 = tpu.matmul %48, %34, %cst_19 {dimension_numbers = #tpu.dot_dimension_numbers<[2], [1], [1], [2], [0, 0, 0, 1, 1, 2], [0], [0]>} : vector<1x8x8xbf16>, vector<1x8x8xbf16>, vector<1x8x8xf32> -> vector<1x8x8xf32>
    "tpu.trace_stop"() : () -> ()
    %50 = vector.extract_strided_slice %9 {offsets = [0, 0, 16], sizes = [1, 8, 8], strides = [1, 1, 1]} : vector<1x8x32xbf16> to vector<1x8x8xbf16>
    %51 = vector.extract_strided_slice %10 {offsets = [0, 0, 16], sizes = [1, 8, 8], strides = [1, 1, 1]} : vector<1x8x32xbf16> to vector<1x8x8xbf16>
    %52 = vector.extract_strided_slice %11 {offsets = [0, 0, 16], sizes = [1, 8, 8], strides = [1, 1, 1]} : vector<1x8x32xbf16> to vector<1x8x8xbf16>
    "tpu.trace_start"() <{level = 10 : i32, message = "bqd,bkd->bqk"}> : () -> ()
    %cst_20 = arith.constant dense<0.000000e+00> : vector<1x8x8xf32>
    %53 = tpu.matmul %50, %51, %cst_20 {dimension_numbers = #tpu.dot_dimension_numbers<[2], [2], [1], [1], [0, 0, 0, 1, 1, 1], [0], [0]>} : vector<1x8x8xbf16>, vector<1x8x8xbf16>, vector<1x8x8xf32> -> vector<1x8x8xf32>
    "tpu.trace_stop"() : () -> ()
    %cst_21 = arith.constant 0.353553385 : f32
    %54 = vector.broadcast %cst_21 : f32 to vector<1x8x8xf32>
    %55 = arith.mulf %53, %54 : vector<1x8x8xf32>
    %cst_22 = arith.constant dense<0xFF800000> : vector<1x8xf32>
    %56 = vector.multi_reduction <maximumf>, %55, %cst_22 [2] : vector<1x8x8xf32> to vector<1x8xf32>
    %57 = vector.shape_cast %56 : vector<1x8xf32> to vector<1x8x1xf32>
    %58 = vector.broadcast %57 : vector<1x8x1xf32> to vector<1x8x8xf32>
    %59 = arith.subf %55, %58 : vector<1x8x8xf32>
    %60 = math.exp %59 : vector<1x8x8xf32>
    %cst_23 = arith.constant dense<0.000000e+00> : vector<1x8xf32>
    %61 = vector.multi_reduction <add>, %60, %cst_23 [2] : vector<1x8x8xf32> to vector<1x8xf32>
    %62 = vector.shape_cast %61 : vector<1x8xf32> to vector<1x8x1xf32>
    %63 = tpu.reciprocal %62 {approx = true} : vector<1x8x1xf32> -> vector<1x8x1xf32>
    %64 = vector.broadcast %63 : vector<1x8x1xf32> to vector<1x8x8xf32>
    %65 = arith.mulf %60, %64 : vector<1x8x8xf32>
    %66 = arith.truncf %65 : vector<1x8x8xf32> to vector<1x8x8xbf16>
    "tpu.trace_start"() <{level = 10 : i32, message = "bqk,bkd->bqd"}> : () -> ()
    %cst_24 = arith.constant dense<0.000000e+00> : vector<1x8x8xf32>
    %67 = tpu.matmul %66, %52, %cst_24 {dimension_numbers = #tpu.dot_dimension_numbers<[2], [1], [1], [2], [0, 0, 0, 1, 1, 2], [0], [0]>} : vector<1x8x8xbf16>, vector<1x8x8xbf16>, vector<1x8x8xf32> -> vector<1x8x8xf32>
    "tpu.trace_stop"() : () -> ()
    %68 = vector.extract_strided_slice %9 {offsets = [0, 0, 24], sizes = [1, 8, 8], strides = [1, 1, 1]} : vector<1x8x32xbf16> to vector<1x8x8xbf16>
    %69 = vector.extract_strided_slice %10 {offsets = [0, 0, 24], sizes = [1, 8, 8], strides = [1, 1, 1]} : vector<1x8x32xbf16> to vector<1x8x8xbf16>
    %70 = vector.extract_strided_slice %11 {offsets = [0, 0, 24], sizes = [1, 8, 8], strides = [1, 1, 1]} : vector<1x8x32xbf16> to vector<1x8x8xbf16>
    "tpu.trace_start"() <{level = 10 : i32, message = "bqd,bkd->bqk"}> : () -> ()
    %cst_25 = arith.constant dense<0.000000e+00> : vector<1x8x8xf32>
    %71 = tpu.matmul %68, %69, %cst_25 {dimension_numbers = #tpu.dot_dimension_numbers<[2], [2], [1], [1], [0, 0, 0, 1, 1, 1], [0], [0]>} : vector<1x8x8xbf16>, vector<1x8x8xbf16>, vector<1x8x8xf32> -> vector<1x8x8xf32>
    "tpu.trace_stop"() : () -> ()
    %cst_26 = arith.constant 0.353553385 : f32
    %72 = vector.broadcast %cst_26 : f32 to vector<1x8x8xf32>
    %73 = arith.mulf %71, %72 : vector<1x8x8xf32>
    %cst_27 = arith.constant dense<0xFF800000> : vector<1x8xf32>
    %74 = vector.multi_reduction <maximumf>, %73, %cst_27 [2] : vector<1x8x8xf32> to vector<1x8xf32>
    %75 = vector.shape_cast %74 : vector<1x8xf32> to vector<1x8x1xf32>
    %76 = vector.broadcast %75 : vector<1x8x1xf32> to vector<1x8x8xf32>
    %77 = arith.subf %73, %76 : vector<1x8x8xf32>
    %78 = math.exp %77 : vector<1x8x8xf32>
    %cst_28 = arith.constant dense<0.000000e+00> : vector<1x8xf32>
    %79 = vector.multi_reduction <add>, %78, %cst_28 [2] : vector<1x8x8xf32> to vector<1x8xf32>
    %80 = vector.shape_cast %79 : vector<1x8xf32> to vector<1x8x1xf32>
    %81 = tpu.reciprocal %80 {approx = true} : vector<1x8x1xf32> -> vector<1x8x1xf32>
    %82 = vector.broadcast %81 : vector<1x8x1xf32> to vector<1x8x8xf32>
    %83 = arith.mulf %78, %82 : vector<1x8x8xf32>
    %84 = arith.truncf %83 : vector<1x8x8xf32> to vector<1x8x8xbf16>
    "tpu.trace_start"() <{level = 10 : i32, message = "bqk,bkd->bqd"}> : () -> ()
    %cst_29 = arith.constant dense<0.000000e+00> : vector<1x8x8xf32>
    %85 = tpu.matmul %84, %70, %cst_29 {dimension_numbers = #tpu.dot_dimension_numbers<[2], [1], [1], [2], [0, 0, 0, 1, 1, 2], [0], [0]>} : vector<1x8x8xbf16>, vector<1x8x8xbf16>, vector<1x8x8xf32> -> vector<1x8x8xf32>
    "tpu.trace_stop"() : () -> ()
    %86 = tpu.concatenate %31, %49, %67, %85 in 2 : vector<1x8x8xf32>, vector<1x8x8xf32>, vector<1x8x8xf32>, vector<1x8x8xf32> -> vector<1x8x32xf32>
    %87 = vector.shape_cast %86 : vector<1x8x32xf32> to vector<8x32xf32>
    %88 = arith.truncf %87 : vector<8x32xf32> to vector<8x32xbf16>
    %cst_30 = arith.constant dense<0.000000e+00> : vector<8x32xf32>
    %89 = tpu.matmul %88, %12, %cst_30 {dimension_numbers = #tpu.dot_dimension_numbers<[1], [0], [0], [1], [0, 0, 1, 1], [], []>} : vector<8x32xbf16>, vector<32x32xbf16>, vector<8x32xf32> -> vector<8x32xf32>
    %90 = vector.broadcast %13 : vector<1x32xf32> to vector<8x32xf32>
    %91 = arith.addf %89, %90 : vector<8x32xf32>
    %92 = arith.extf %1 : vector<8x32xbf16> to vector<8x32xf32>
    %93 = arith.addf %91, %92 : vector<8x32xf32>
    %c0_31 = arith.constant 0 : index
    %c0_32 = arith.constant 0 : index
    %94 = vector.load %arg6[%c0_31, %c0_32] : memref<1x32xf32, #tpu.memory_space<vmem>>, vector<1x32xf32>
    %c0_33 = arith.constant 0 : index
    %c0_34 = arith.constant 0 : index
    %95 = vector.load %arg7[%c0_33, %c0_34] : memref<1x32xf32, #tpu.memory_space<vmem>>, vector<1x32xf32>
    %cst_35 = arith.constant dense<0.000000e+00> : vector<8xf32>
    %96 = vector.multi_reduction <add>, %93, %cst_35 [1] : vector<8x32xf32> to vector<8xf32>
    %97 = vector.shape_cast %96 : vector<8xf32> to vector<8x1xf32>
    %cst_36 = arith.constant 3.200000e+01 : f32
    %98 = vector.broadcast %cst_36 : f32 to vector<8x1xf32>
    %99 = arith.divf %97, %98 : vector<8x1xf32>
    %100 = vector.broadcast %99 : vector<8x1xf32> to vector<8x32xf32>
    %101 = arith.subf %93, %100 : vector<8x32xf32>
    %102 = arith.mulf %101, %101 : vector<8x32xf32>
    %cst_37 = arith.constant dense<0.000000e+00> : vector<8xf32>
    %103 = vector.multi_reduction <add>, %102, %cst_37 [1] : vector<8x32xf32> to vector<8xf32>
    %104 = vector.shape_cast %103 : vector<8xf32> to vector<8x1xf32>
    %cst_38 = arith.constant 3.200000e+01 : f32
    %105 = vector.broadcast %cst_38 : f32 to vector<8x1xf32>
    %106 = arith.divf %104, %105 : vector<8x1xf32>
    %cst_39 = arith.constant 9.99999974E-6 : f32
    %107 = vector.broadcast %cst_39 : f32 to vector<8x1xf32>
    %108 = arith.addf %106, %107 : vector<8x1xf32>
    %109 = math.rsqrt %108 : vector<8x1xf32>
    %110 = vector.broadcast %109 : vector<8x1xf32> to vector<8x32xf32>
    %111 = arith.mulf %101, %110 : vector<8x32xf32>
    %112 = vector.broadcast %94 : vector<1x32xf32> to vector<8x32xf32>
    %113 = arith.mulf %111, %112 : vector<8x32xf32>
    %114 = vector.broadcast %95 : vector<1x32xf32> to vector<8x32xf32>
    %115 = arith.addf %113, %114 : vector<8x32xf32>
    %c0_40 = arith.constant 0 : index
    %c0_41 = arith.constant 0 : index
    %116 = vector.load %arg8[%c0_40, %c0_41] : memref<1x32xf32, #tpu.memory_space<vmem>>, vector<1x32xf32>
    %117 = vector.broadcast %116 : vector<1x32xf32> to vector<8x32xf32>
    %118 = arith.addf %115, %117 : vector<8x32xf32>
    %119 = math.cos %118 : vector<8x32xf32>
    %120 = arith.addf %119, %115 : vector<8x32xf32>
    %c0_42 = arith.constant 0 : index
    %c0_43 = arith.constant 0 : index
    %121 = vector.load %arg9[%c0_42, %c0_43] : memref<1x32xf32, #tpu.memory_space<vmem>>, vector<1x32xf32>
    %c0_44 = arith.constant 0 : index
    %c0_45 = arith.constant 0 : index
    %122 = vector.load %arg10[%c0_44, %c0_45] : memref<1x32xf32, #tpu.memory_space<vmem>>, vector<1x32xf32>
    %cst_46 = arith.constant dense<0.000000e+00> : vector<8xf32>
    %123 = vector.multi_reduction <add>, %120, %cst_46 [1] : vector<8x32xf32> to vector<8xf32>
    %124 = vector.shape_cast %123 : vector<8xf32> to vector<8x1xf32>
    %cst_47 = arith.constant 3.200000e+01 : f32
    %125 = vector.broadcast %cst_47 : f32 to vector<8x1xf32>
    %126 = arith.divf %124, %125 : vector<8x1xf32>
    %127 = vector.broadcast %126 : vector<8x1xf32> to vector<8x32xf32>
    %128 = arith.subf %120, %127 : vector<8x32xf32>
    %129 = arith.mulf %128, %128 : vector<8x32xf32>
    %cst_48 = arith.constant dense<0.000000e+00> : vector<8xf32>
    %130 = vector.multi_reduction <add>, %129, %cst_48 [1] : vector<8x32xf32> to vector<8xf32>
    %131 = vector.shape_cast %130 : vector<8xf32> to vector<8x1xf32>
    %cst_49 = arith.constant 3.200000e+01 : f32
    %132 = vector.broadcast %cst_49 : f32 to vector<8x1xf32>
    %133 = arith.divf %131, %132 : vector<8x1xf32>
    %cst_50 = arith.constant 9.99999974E-6 : f32
    %134 = vector.broadcast %cst_50 : f32 to vector<8x1xf32>
    %135 = arith.addf %133, %134 : vector<8x1xf32>
    %136 = math.rsqrt %135 : vector<8x1xf32>
    %137 = vector.broadcast %136 : vector<8x1xf32> to vector<8x32xf32>
    %138 = arith.mulf %128, %137 : vector<8x32xf32>
    %139 = vector.broadcast %121 : vector<1x32xf32> to vector<8x32xf32>
    %140 = arith.mulf %138, %139 : vector<8x32xf32>
    %141 = vector.broadcast %122 : vector<1x32xf32> to vector<8x32xf32>
    %142 = arith.addf %140, %141 : vector<8x32xf32>
    %143 = vector.shape_cast %142 : vector<8x32xf32> to vector<1x8x32xf32>
    %144 = arith.truncf %143 : vector<1x8x32xf32> to vector<1x8x32xbf16>
    %c0_51 = arith.constant 0 : index
    %c0_52 = arith.constant 0 : index
    %c0_53 = arith.constant 0 : index
    %145 = vector.load %arg11[%c0_51, %c0_52, %c0_53] : memref<1x8x32xbf16, #tpu.memory_space<vmem>>, vector<1x8x32xbf16>
    tpu.vector_store %arg11[%c0_51, %c0_52, %c0_53], %144 {strides = array<i32>} : memref<1x8x32xbf16, #tpu.memory_space<vmem>>, vector<1x8x32xbf16>,
    return
  }
  func.func @transform_0(%arg0: i32) -> (i32, i32, i32) {
    %c0_i32 = arith.constant 0 : i32
    %c0_i32_0 = arith.constant 0 : i32
    %c0_i32_1 = arith.constant 0 : i32
    return %arg0, %c0_i32, %c0_i32_0 : i32, i32, i32
  }
  func.func @transform_1(%arg0: i32) -> (i32, i32) {
    %c0_i32 = arith.constant 0 : i32
    %c0_i32_0 = arith.constant 0 : i32
    %c0_i32_1 = arith.constant 0 : i32
    return %c0_i32, %c0_i32_0 : i32, i32
  }
  func.func @transform_2(%arg0: i32) -> (i32, i32) {
    %c0_i32 = arith.constant 0 : i32
    %c0_i32_0 = arith.constant 0 : i32
    %c0_i32_1 = arith.constant 0 : i32
    return %c0_i32, %c0_i32_0 : i32, i32
  }
  func.func @transform_3(%arg0: i32) -> (i32, i32) {
    %c0_i32 = arith.constant 0 : i32
    %c0_i32_0 = arith.constant 0 : i32
    %c0_i32_1 = arith.constant 0 : i32
    return %c0_i32, %c0_i32_0 : i32, i32
  }
  func.func @transform_4(%arg0: i32) -> (i32, i32) {
    %c0_i32 = arith.constant 0 : i32
    %c0_i32_0 = arith.constant 0 : i32
    %c0_i32_1 = arith.constant 0 : i32
    return %c0_i32, %c0_i32_0 : i32, i32
  }
  func.func @transform_5(%arg0: i32) -> (i32, i32) {
    %c0_i32 = arith.constant 0 : i32
    %c0_i32_0 = arith.constant 0 : i32
    %c0_i32_1 = arith.constant 0 : i32
    return %c0_i32, %c0_i32_0 : i32, i32
  }
  func.func @transform_6(%arg0: i32) -> (i32, i32) {
    %c0_i32 = arith.constant 0 : i32
    %c0_i32_0 = arith.constant 0 : i32
    %c0_i32_1 = arith.constant 0 : i32
    return %c0_i32, %c0_i32_0 : i32, i32
  }
  func.func @transform_7(%arg0: i32) -> (i32, i32) {
    %c0_i32 = arith.constant 0 : i32
    %c0_i32_0 = arith.constant 0 : i32
    %c0_i32_1 = arith.constant 0 : i32
    return %c0_i32, %c0_i32_0 : i32, i32
  }
  func.func @transform_8(%arg0: i32) -> (i32, i32) {
    %c0_i32 = arith.constant 0 : i32
    %c0_i32_0 = arith.constant 0 : i32
    %c0_i32_1 = arith.constant 0 : i32
    return %c0_i32, %c0_i32_0 : i32, i32
  }
  func.func @transform_9(%arg0: i32) -> (i32, i32) {
    %c0_i32 = arith.constant 0 : i32
    %c0_i32_0 = arith.constant 0 : i32
    %c0_i32_1 = arith.constant 0 : i32
    return %c0_i32, %c0_i32_0 : i32, i32
  }
  func.func @transform_10(%arg0: i32) -> (i32, i32, i32) {
    %c0_i32 = arith.constant 0 : i32
    %c0_i32_0 = arith.constant 0 : i32
    %c0_i32_1 = arith.constant 0 : i32
    return %arg0, %c0_i32, %c0_i32_0 : i32, i32, i32
  }
}

</mosaic_0001>

<bundles_post_ra>
// kernel: tpu_custom_call.1
= control target key start
LH: loop header
LB: loop body
LE: loop exit
PB: predicated region body
PF: predicated region fallthrough
CT: control target
= control target key end

     0   :  { %15 = vsyncpa [#allocation3], 0  ;;  %s2133_s0 = inlined_call_operand.hbm [shape: bf16[2,8,32], index: 0, kind: input, shape index: {}]   ;;  %s2134_s1 = inlined_call_operand.hbm [shape: bf16[32,96], index: 1, kind: input, shape index: {}]   ;;  %s2135_s2 = inlined_call_operand.vmem [shape: f32[1,96], index: 2, kind: input, shape index: {}]   ;;  %s2136_s3 = inlined_call_operand.hbm [shape: bf16[32,32], index: 3, kind: input, shape index: {}]   ;;  %s2137_s4 = inlined_call_operand.vmem [shape: f32[1,32], index: 4, kind: input, shape index: {}]   ;;  %s2138_s5 = inlined_call_operand.vmem [shape: f32[1,32], index: 5, kind: input, shape index: {}]   ;;  %s2139_s6 = inlined_call_operand.vmem [shape: f32[1,32], index: 6, kind: input, shape index: {}]   ;;  %s2140_s7 = inlined_call_operand.vmem [shape: f32[1,32], index: 7, kind: input, shape index: {}]   ;;  %s2141_s8 = inlined_call_operand.vmem [shape: f32[1,32], index: 8, kind: input, shape index: {}]   ;;  %s2142_s9 = inlined_call_operand.vmem [shape: f32[1,32], index: 9, kind: input, shape index: {}]   ;;  %s2143_s10 = inlined_call_operand.hbm [shape: bf16[2,8,32], index: 10, kind: output, shape index: {}]  }
   0x1   :  { %17 = vsyncpa [#allocation3 + $0x1], 0 }
   0x2   :  { %18 = vsyncpa [#allocation6], 0 }
   0x3   :  { %19 = vsyncpa [#allocation4], 0 }
   0x4   :  { %21 = vsyncpa [#allocation4 + $0x1], 0  ;;  %s1773_s13 = smov 0   ;;  %s1775_s14 = smov 0  }
   0x5   :  { %s1777_s15 = smov 0   ;;  %s1779_s16 = smov 0  }
   0x6 LB: > { %2149 = sst [smem:[#allocation12_spill]] %s1676_s13  ;;  %s1794_s17 = sadd.s32 4294967295, %s1688_s16   ;;  %s1688_s16 = sphi %s1779_s16, %s2169_s16   ;;  %s1684_s15 = sphi %s1777_s15, %s2168_s15   ;;  %s1680_s14 = sphi %s1775_s14, %s2167_s14   ;;  %s1676_s13 = sphi %s1773_s13, %s2166_s13  }
   0x7   : > { %s1282_s18 = sadd.s32 4294967294, %s1688_s16   ;;  %p47_p0 = scmp.ne.s32.totalorder %s1680_s14, %s1676_s13 }
   0x8   : > { %p2144_p1 = scmp.eq.s32.totalorder %s1794_s17, 0  ;;  %p266_p3 = scmp.eq.s32.totalorder %s1282_s18, 1 }
   0x9   : > { %p1283_p5 = scmp.ge.s32.totalorder %s1688_s16, 1  ;;  %p273_p7 = scmp.lt.s32.totalorder %s1688_s16, 3 }
   0xa   : > { %p1803_p4 = por %p2144_p1, %p47_p0  ;;  %p1808_p6 = por %p266_p3, %p47_p0 }
   0xb   : > { %p1813_p8 = pnand %p1283_p5, %p273_p7  ;;  %s1690_s22 = smov [#allocation5]  }
   0xc   : > { %s2150_s19 = scalar_select %p1803_p4, 1, 0 }
   0xd   : > { %s2151_s20 = scalar_select %p1808_p6, 1, 0 }
   0xe   : > { %s285_s23 = sshll.u32 %s1690_s22, 4  ;;  %p1425_p9 = pneg %p1813_p8  ;;  %s1817_s23 = int_to_ptr.vmem [resolvable:$true] %s285_s23 }
   0xf   : > { %2152 = sst [smem:[#allocation13_spill]] %s2151_s20  ;;  %s1691_s25 = smov [#allocation7]  }
  0x10   : > { %p1824_p11 = pnand %p1425_p9, %p2144_p1  ;;  %s301_s26 = sshll.u32 %s1691_s25, 4  ;;  %s1828_s26 = int_to_ptr.vmem [resolvable:$true] %s301_s26 }
  0x11   : > { %s1532_s29 = scalar_lea.hbm %s2134_s1, 256 }
  0x12   : > { %p1533_p12 = scmp.ne.s32.totalorder %s2134_s1, %s1532_s29  ;;  %p1534_p13 = pneg %p1824_p11 }
  0x13   : > { %p1539_p5 = scmp.lt.u32.totalorder %s1532_s29, %s2134_s1 }
  0x14   : > { %p1535_p0 = pnand %p1534_p13, %p1533_p12 }
  0x16   : > { %p1536_p3 = pneg %p1535_p0 }
  0x18   : > { %p1541_p7 = pnand %p1539_p5, %p1536_p3 }
  0x1a   : > { %1544 = shalt.err (!%p1541_p7)
}
  0x1b   : > { %s1545_s22 = scalar_lea.vmem %s1817_s23, 256  ;;  %p1553_p2 = scmp.lt.s32.totalorder %s1817_s23, %s1817_s23 }
  0x1c   : > { %p1546_p9 = scmp.ne.s32.totalorder %s1817_s23, %s1545_s22  ;;  %p1554_p12 = scmp.lt.s32.totalorder %s1545_s22, %s1545_s22 }
  0x1e   : > { %p1548_p10 = pnand %p1546_p9, %p1534_p13  ;;  %p1555_p0 = por %p1554_p12, %p1553_p2 }
  0x20   : > { %p1549_p1 = pneg %p1548_p10 }
  0x22   : > { %p1556_p6 = pnand %p1555_p0, %p1549_p1 }
  0x24   : > { %1559 = shalt.err (!%p1556_p6)
}
  0x25   : > { %s1692_s25 = smov 64   ;;  %s1693_s27 = smov 4  }
  0x26   : > { %1428 = dma.hbm_to_vmem [thread:$0]  (!%p1824_p11), %s2134_s1, 256, %s1817_s23, [#allocation6], %s1692_s25, %s1692_s25, %s1693_s27  }
  0x27   : > { %s1560_s12 = scalar_lea.hbm %s2136_s3, 256 }
  0x28   : > { %p1561_p2 = scmp.ne.s32.totalorder %s2136_s3, %s1560_s12  ;;  %p1567_p10 = scmp.lt.u32.totalorder %s1560_s12, %s2136_s3 }
  0x2a   : > { %p1563_p1 = pnand %p1561_p2, %p1534_p13 }
  0x2c   : > { %p1564_p6 = pneg %p1563_p1 }
  0x2e   : > { %p1569_p3 = pnand %p1567_p10, %p1564_p6 }
  0x30   : > { %1572 = shalt.err (!%p1569_p3)
}
  0x31   : > { %s1573_s23 = scalar_lea.vmem %s1828_s26, 256  ;;  %p1581_p12 = scmp.lt.s32.totalorder %s1828_s26, %s1828_s26 }
  0x32   : > { %p1574_p5 = scmp.ne.s32.totalorder %s1828_s26, %s1573_s23  ;;  %p1582_p0 = scmp.lt.s32.totalorder %s1573_s23, %s1573_s23 }
  0x34   : > { %p1576_p7 = pnand %p1574_p5, %p1534_p13  ;;  %p1583_p2 = por %p1582_p0, %p1581_p12 }
  0x36   : > { %p1577_p9 = pneg %p1576_p7 }
  0x38   : > { %p1584_p1 = pnand %p1583_p2, %p1577_p9 }
  0x3a   : > { %1587 = shalt.err (!%p1584_p1)
}
  0x3b   : > { %1431 = dma.hbm_to_vmem [thread:$0]  (!%p1824_p11), %s2136_s3, 256, %s1828_s26, [#allocation6], %s1692_s25, %s1692_s25, %s1693_s27  }
  0x3c   : > { %s1883_s28 = sadd.s32 1, %s1688_s16   ;;  %s34_s24 = sadd.s32 1, %s1684_s15 }
  0x3d   : > { %s31_s29 = ssub.s32 %s1688_s16, %s1883_s28  ;;  %p41_p13 = scmp.ne.s32.totalorder %s1684_s15, %s1680_s14 }
  0x3e   : > { %p32_p6 = scmp.eq.s32.totalorder %s31_s29, 0  ;;  %p42_p10 = scmp.eq.s32.totalorder %s1688_s16, 0 }
  0x3f   : > { %p2155_p3 = scmp.eq.s32.totalorder %s1794_s17, 1  ;;  %p1442_p7 = scmp.lt.s32.totalorder %s1688_s16, 2 }
  0x40   : > { %s1899_s11 = scalar_select %p32_p6, %s1684_s15, %s34_s24  }
  0x41   : > { %p1893_p5 = por %p2155_p3, %p41_p13  ;;  %p43_p9 = por %p42_p10, %p41_p13 }
  0x42   : > { %s333_s12 = sand.u32 1, %s1684_s15   ;;  %s1288_s26 = sshll.u32 %s1688_s16, 6 }
  0x43   : > { %s2156_s30 = scalar_select %p1893_p5, 1, 0 }
  0x44   : > { %s1287_s18 = sshll.u32 %s333_s12, 2  ;;  %s1906_s22 = scalar_lea.hbm %s2133_s0, %s1288_s26 }
  0x45   : > { %s337_s23 = scalar_lea.vmem [#allocation2], %s1287_s18  ;;  %p1910_p11 = pnand %p1442_p7, %p43_p9 }
  0x46   : > { %s344_s13 = sshll.u32 %s337_s23, 4  ;;  %s334_s24 = scalar_lea.sflag [#allocation3], %s333_s12  ;;  %s1908_s13 = int_to_ptr.vmem [resolvable:$true] %s344_s13 }
  0x47   : > { %s1588_s29 = scalar_lea.hbm %s1906_s22, 64  ;;  %p1590_p0 = pneg %p1910_p11 }
  0x48   : > { %p1589_p12 = scmp.ne.s32.totalorder %s1906_s22, %s1588_s29  ;;  %s1593_s25 = scalar_lea.hbm %s2133_s0, 128 }
  0x49   : > { %p1594_p13 = scmp.lt.u32.totalorder %s1906_s22, %s2133_s0  ;;  %p1595_p6 = scmp.lt.u32.totalorder %s1593_s25, %s1588_s29 }
  0x4a   : > { %p1591_p2 = pnand %p1590_p0, %p1589_p12  ;;  %p1597_p3 = scmp.lt.u32.totalorder %s1588_s29, %s1906_s22 }
  0x4b   : > { %p1596_p10 = por %p1595_p6, %p1594_p13 }
  0x4c   : > { %p1592_p1 = pneg %p1591_p2 }
  0x4d   : > { %p1598_p7 = por %p1597_p3, %p1596_p10 }
  0x4f   : > { %p1599_p9 = pnand %p1598_p7, %p1592_p1 }
  0x51   : > { %1602 = shalt.err (!%p1599_p9)
}
  0x52   : > { %s1603_s12 = scalar_lea.vmem %s1908_s13, 64  ;;  %s1694_s26 = smov [#allocation2]  }
  0x53   : > { %p1604_p12 = scmp.ne.s32.totalorder %s1908_s13, %s1603_s12  ;;  %s1608_s18 = sshll.u32 %s1694_s26, 4  ;;  %s1609_s18 = int_to_ptr.vmem [resolvable:$false] %s1608_s18 }
  0x54   : > { %s1610_s27 = scalar_lea.vmem %s1609_s18, 128  ;;  %p1611_p4 = scmp.lt.s32.totalorder %s1908_s13, %s1609_s18 }
  0x55   : > { %p1606_p2 = pnand %p1604_p12, %p1590_p0  ;;  %p1612_p13 = scmp.lt.s32.totalorder %s1610_s27, %s1603_s12 }
  0x57   : > { %p1607_p5 = pneg %p1606_p2  ;;  %p1613_p6 = por %p1612_p13, %p1611_p4 }
  0x59   : > { %p1614_p10 = pnand %p1613_p6, %p1607_p5 }
  0x5b   : > { %1617 = shalt.err (!%p1614_p10)
}
  0x5c   : > { %1435 = dma.hbm_to_vmem [thread:$0]  (!%p1910_p11), %s1906_s22, 64, %s1908_s13, %s334_s24  }
  0x5d   : > { %353 = sbr.rel (%p1813_p8) target bundleno = 2316 (0x90c), region = 60  ;;  %s1942_s29 = sand.u32 (!%p1813_p8), 1, %s1680_s14  }
  0x5e   : > { %s1290_s25 = sshll.u32 (!%p1813_p8), %s1942_s29, 2  ;;  %s356_s23 = scalar_lea.sflag (!%p1813_p8), [#allocation3], %s1942_s29 }
  0x5f   : > { %s359_s12 = scalar_lea.vmem (!%p1813_p8), [#allocation2], %s1290_s25  ;;  %p2158_p4 = scmp.ne.s32.totalorder (!%p1813_p8), %s2150_s19, 0 }
  0x64   : > { %1663 = dma.done.wait (%p2158_p4), %s356_s23, 64  }
  0x65   : > { %1665 = vsyncadd (%p2158_p4), %s356_s23, 4294967232  ;;  %p2159_p5 = scmp.eq.s32.totalorder %s1794_s17, 0 }
  0x67   : > { %1667 = dma.done.wait (%p2159_p5), [#allocation6], 512   ;;  %p2160_p8 = pmov %p2159_p5 }
  0x68   : > { %v1695_v0 = vmov 0.0   ;;  %vm1696_vm0 = vmmov 0   ;;  %v1504_v1 = vld [vmem:[#allocation5] sm:$0xff]   ;;  %v1505_v2 = vld [vmem:[#allocation5 + $0x8] sm:$0xff]   ;;  %v1963_v3 = vld [vmem:[%s359_s12] sm:$0xf] }
  0x69   : > { %1669 = vsyncadd (%p2160_p8), [#allocation6], 4294966784  ;;  %1345 = vmatprep.subr.bf16.mxu0 %v1695_v0  ;;  %1349 = vmatprep.mubr.msk.bf16.mxu0 %vm1696_vm0, %v1695_v0  ;;  %vm429_vm1 = vcmask 261120   ;;  %v1294_v4 = vld [vmem:[%s2135_s2] ss:$0 sm:$0xff]  ;;  %s1697_s22 = smov 120  }
  0x6a   : > { %1353 = vmatprep.subr.bf16.mxu1 %v1695_v0  ;;  %1355 = vmatprep.mubr.msk.bf16.mxu1 %vm1696_vm0, %v1695_v0  ;;  %s1698_s13 = smov 96   ;;  %s1699_s20 = smov 80   ;;  %vm482_vm2 = vcmask 64512   ;;  %vm547_vm3 = vcmask 1043456   ;;  %vm937_vm4 = vcmask 130048   ;;  %vm939_vm5 = vcmask 195584  }
  0x6b   : > { %1346 = vmatpush3.bf16.msra.mxu0 %v1504_v1  ;;  %s1700_s24 = smov 88   ;;  %s1701_s26 = smov 72  }
  0x6c   : > { %1347 = vmatprep.subr.bf16.mxu0 %v1695_v0  ;;  %s1702_s18 = smov 112   ;;  %s1703_s27 = smov 104  }
  0x6d   : > { %s1704_s23 = smov 56   ;;  %s1705_s12 = smov 64  }
  0x6e   : > { %s1706_s19 = smov 40   ;;  %s1707_s21 = smov 48  }
  0x6f   : > { %1348 = vmatpush3.bf16.msra.mxu0 %v1505_v2  ;;  %p2161_p0 = scmp.ne.s32.totalorder %s2156_s30, 0 }
  0x70   : > { %1359 = vmatprep.subr.bf16.mxu0 %v1695_v0 }
  0x72   : > { %1350 = vmatmul.mubr.msk.bf16.vlgmr.msra.gmra.mrb[0].mxu0 %vm429_vm1, %v1963_v3 }
  0x73   : > { %1361 = vmatprep.mubr.msk.bf16.mxu0 %vm1696_vm0, %v1695_v0 }
 0x145   : > { %v467_v5 = vpop.f32.mrb[0].mxu0 }
 0x146   : > { %v468_v6 = vadd.f32 %v1294_v4, %v467_v5  ;;  %v1351_v7 = vpop.f32.mrb[1].mxu0 }
 0x147   : > { %v470_v8 = vpop.f32.mrb[2].mxu0 }
 0x148   : > { %v1973_v9 = vpack.c.bf16 %v468_v6, %v468_v6  ;;  %v1352_v10 = vpop.f32.mrb[3].mxu0 }
 0x14a   : > { %591 = vrot.lane.b32.xlu1 %v1973_v9, %s1697_s22  ;;  %480 = vrot.lane.b32.xlu0 %v1973_v9, %s1698_s13  ;;  %s1708_s22 = smov 8   ;;  %s1709_s13 = smov 16  }
 0x14e   : > { %704 = vrot.lane.b32.xlu1 %v1973_v9, %s1699_s20  ;;  %593 = vrot.lane.b32.xlu0 %v1973_v9, %s1700_s24  ;;  %s1710_s20 = smov 24  }
 0x152   : > { %815 = vrot.lane.b32.xlu1 %v1973_v9, %s1701_s26  ;;  %702 = vrot.lane.b32.xlu0 %v1973_v9, %s1702_s18  ;;  %s1320_s26 = sshll.u32 %s1794_s17, 6  ;;  %s403_s18 = scalar_lea.vmem [#allocation8], %s1290_s25 }
 0x153   : > { %s1717_s17 = smov [#allocation8]  }
 0x154   : > { %s1622_s25 = sshll.u32 %s1717_s17, 4  ;;  %s1623_s25 = int_to_ptr.vmem [resolvable:$false] %s1622_s25 }
 0x156   : > { %813 = vrot.lane.b32.xlu0 %v1973_v9, %s1703_s27  ;;  %s1193_s27 = sshll.u32 %s403_s18, 4  ;;  %s2091_s27 = int_to_ptr.vmem [resolvable:$true] %s1193_s27 }
 0x157   : > { %p1625_p7 = scmp.lt.s32.totalorder %s2091_s27, %s1623_s25 }
 0x1bc   : > { %v481_v11 = vpop.permute.xlu0 %480  ;;  %v592_v14 = vpop.permute.xlu1 %591 }
 0x1bd   : > { %v487_v12 = vsel %vm482_vm2, %v481_v11, 0 }
 0x1be   : > { %1354 = vmatpush3.bf16.xpose.msra.mxu1 %v487_v12 }
 0x1bf   : > { %1365 = vmatprep.subr.bf16.mxu1 %v1695_v0 }
 0x1c0   : > { %v594_v13 = vpop.permute.xlu0 %593  ;;  %v705_v16 = vpop.permute.xlu1 %704 }
 0x1c1   : > { %v599_v15 = vsel %vm482_vm2, %v594_v13, 0  ;;  %v710_v17 = vsel %vm482_vm2, %v705_v16, 0 }
 0x1c4   : > { %v816_v18 = vpop.permute.xlu1 %815  ;;  %v703_v19 = vpop.permute.xlu0 %702 }
 0x1c5   : > { %1356 = vmatmul.mubr.msk.bf16.vlgmr.msra.gmra.mrb[0].mxu1 %vm482_vm2, %v1973_v9  ;;  %v821_v20 = vsel %vm482_vm2, %v816_v18, 0 }
 0x1c6   : > { %1366 = vmatpush3.bf16.xpose.msra.mxu1 %v599_v15  ;;  %1367 = vmatprep.mubr.msk.bf16.mxu1 %vm1696_vm0, %v1695_v0 }
 0x1c7   : > { %1377 = vmatprep.subr.bf16.mxu1 %v1695_v0 }
 0x1c8   : > { %v814_v21 = vpop.permute.xlu0 %813 }
 0x1cd   : > { %1368 = vmatmul.mubr.msk.bf16.vlgmr.msra.gmra.mrb[4].mxu1 %vm482_vm2, %v592_v14 }
 0x1ce   : > { %1378 = vmatpush3.bf16.xpose.msra.mxu1 %v710_v17  ;;  %1379 = vmatprep.mubr.msk.bf16.mxu1 %vm1696_vm0, %v1695_v0 }
 0x1cf   : > { %1389 = vmatprep.subr.bf16.mxu1 %v1695_v0 }
 0x1d5   : > { %1380 = vmatmul.mubr.msk.bf16.vlgmr.msra.gmra.mrb[8].mxu1 %vm482_vm2, %v703_v19 }
 0x1d6   : > { %1390 = vmatpush3.bf16.xpose.msra.mxu1 %v821_v20  ;;  %1391 = vmatprep.mubr.msk.bf16.mxu1 %vm1696_vm0, %v1695_v0 }
 0x1d7   : > { %1401 = vmatprep.subr.bf16.mxu1 %v1695_v0 }
 0x1dd   : > { %1392 = vmatmul.mubr.msk.bf16.vlgmr.msra.gmra.mrb[12].mxu1 %vm482_vm2, %v814_v21 }
 0x1de   : > { %1405 = vmatprep.mubr.msk.bf16.mxu1 %vm1696_vm0, %v1695_v0 }
 0x298   : > { %v523_v22 = vpop.f32.mrb[0].mxu1 }
 0x299   : > { %v529_v23 = vmul.f32 0.35355338, %v523_v22  ;;  %v1357_v24 = vpop.f32.mrb[1].mxu1 }
 0x29a   : > { %v526_v25 = vpop.f32.mrb[2].mxu1 }
 0x29b   : > { %v1358_v26 = vpop.f32.mrb[3].mxu1  ;;  %v530_v27 = vsel %vm482_vm2, %v529_v23, -inf }
 0x29c   : > { %531 = vmax.xlane.f32.xlu1 %v530_v27 }
 0x2a0   : > { %v635_v28 = vpop.f32.mrb[4].mxu1 }
 0x2a1   : > { %v641_v29 = vmul.f32 0.35355338, %v635_v28  ;;  %v1369_v30 = vpop.f32.mrb[5].mxu1 }
 0x2a2   : > { %v638_v31 = vpop.f32.mrb[6].mxu1 }
 0x2a3   : > { %v1370_v32 = vpop.f32.mrb[7].mxu1  ;;  %v642_v33 = vsel %vm482_vm2, %v641_v29, -inf }
 0x2a4   : > { %643 = vmax.xlane.f32.xlu0 %v642_v33 }
 0x2a8   : > { %v746_v34 = vpop.f32.mrb[8].mxu1 }
 0x2a9   : > { %v752_v35 = vmul.f32 0.35355338, %v746_v34  ;;  %v1381_v36 = vpop.f32.mrb[9].mxu1 }
 0x2aa   : > { %v749_v37 = vpop.f32.mrb[10].mxu1  ;;  %v1506_v36 = vld [vmem:[#allocation7] sm:$0xff]  }
 0x2ab   : > { %v1382_v38 = vpop.f32.mrb[11].mxu1  ;;  %v753_v39 = vsel %vm482_vm2, %v752_v35, -inf  ;;  %1402 = vmatpush3.bf16.msra.mxu1 %v1506_v36  ;;  %v1507_v37 = vld [vmem:[#allocation7 + $0x8] sm:$0xff]  }
 0x2ac   : > { %754 = vmax.xlane.f32.xlu0 %v753_v39  ;;  %1403 = vmatprep.subr.bf16.mxu1 %v1695_v0 }
 0x2af   : > { %1404 = vmatpush3.bf16.msra.mxu1 %v1507_v37 }
 0x2b0   : > { %v857_v40 = vpop.f32.mrb[12].mxu1 }
 0x2b1   : > { %v863_v41 = vmul.f32 0.35355338, %v857_v40  ;;  %v1393_v42 = vpop.f32.mrb[13].mxu1 }
 0x2b2   : > { %v860_v43 = vpop.f32.mrb[14].mxu1 }
 0x2b3   : > { %v1394_v44 = vpop.f32.mrb[15].mxu1  ;;  %v864_v45 = vsel %vm482_vm2, %v863_v41, -inf }
 0x2b4   : > { %865 = vmax.xlane.f32.xlu1 %v864_v45 }
 0x329   : > { %v532_v46 = vpop.xlane.xlu1 %531 }
 0x32a   : > { %v533_v47 = vsub.f32 %v529_v23, %v532_v46 }
 0x32c   : > { %v534_v48 = vmul.f32 1.442695, %v533_v47 }
 0x32e   : > { %1508 = vpow2.f32 %v534_v48 }
 0x331   : > { %v644_v49 = vpop.xlane.xlu0 %643 }
 0x332   : > { %v645_v50 = vsub.f32 %v641_v29, %v644_v49 }
 0x334   : > { %v646_v51 = vmul.f32 1.442695, %v645_v50 }
 0x336   : > { %1510 = vpow2.f32 %v646_v51 }
 0x338   : > { %v1509_v52 = vpop.eup %1508 }
 0x339   : > { %v755_v53 = vpop.xlane.xlu0 %754  ;;  %v536_v54 = vsel %vm482_vm2, %v1509_v52, 0.0 }
 0x33a   : > { %v756_v55 = vsub.f32 %v752_v35, %v755_v53  ;;  %537 = vadd.xlane.f32.xlu0 %v536_v54  ;;  %v1003_v53 = vunpack.c.l.bf16 %v1963_v3 }
 0x33c   : > { %v757_v56 = vmul.f32 1.442695, %v756_v55 }
 0x33e   : > { %1512 = vpow2.f32 %v757_v56 }
 0x340   : > { %v1511_v57 = vpop.eup %1510 }
 0x341   : > { %v648_v58 = vsel %vm482_vm2, %v1511_v57, 0.0  ;;  %v866_v61 = vpop.xlane.xlu1 %865 }
 0x342   : > { %649 = vadd.xlane.f32.xlu1 %v648_v58  ;;  %v867_v62 = vsub.f32 %v863_v41, %v866_v61 }
 0x344   : > { %v868_v63 = vmul.f32 1.442695, %v867_v62 }
 0x346   : > { %1514 = vpow2.f32 %v868_v63 }
 0x348   : > { %v1513_v59 = vpop.eup %1512 }
 0x349   : > { %v759_v60 = vsel %vm482_vm2, %v1513_v59, 0.0 }
 0x34a   : > { %760 = vadd.xlane.f32.xlu0 %v759_v60 }
 0x350   : > { %v1515_v1 = vpop.eup %1514 }
 0x351   : > { %v870_v2 = vsel %vm482_vm2, %v1515_v1, 0.0 }
 0x353   : > { %654 = vrot.lane.b32.xlu1 %v1973_v9, %s1704_s23 }
 0x360   : > { %542 = vrot.lane.b32.xlu0 %v1973_v9, %s1705_s12 }
 0x364   : > { %876 = vrot.lane.b32.xlu0 %v1973_v9, %s1706_s19  ;;  %s2089_s19 = scalar_lea.hbm %s2143_s10, %s1320_s26 }
 0x377   : > { %871 = vadd.xlane.f32.xlu1 %v870_v2 }
 0x388   : > { %765 = vrot.lane.b32.xlu1 %v1973_v9, %s1707_s21  ;;  %s1180_s21 = scalar_lea.sflag [#allocation4], %s1942_s29 }
 0x3c7   : > { %v538_v4 = vpop.xlane.xlu0 %537 }
 0x3c8   : > { %1516 = vrcp.f32 %v538_v4 }
 0x3cf   : > { %v650_v5 = vpop.xlane.xlu1 %649 }
 0x3d0   : > { %1518 = vrcp.f32 %v650_v5 }
 0x3d2   : > { %v1517_v6 = vpop.eup %1516 }
 0x3d3   : > { %v540_v8 = vmul.f32 %v1517_v6, %v1509_v52  ;;  %v655_v12 = vpop.permute.xlu1 %654  ;;  %v1306_v52 = vld [vmem:[%s2137_s4] ss:$0 sm:$0xff] }
 0x3d4   : > { %v660_v15 = vsel %vm547_vm3, %v655_v12, 0  ;;  %v1312_v12 = vld [vmem:[%s2140_s7] ss:$0 sm:$0xff] }
 0x3d5   : > { %v541_v13 = vpack.c.bf16 %v540_v8, %v540_v8 }
 0x3d7   : > { %v761_v7 = vpop.xlane.xlu0 %760 }
 0x3d8   : > { %1520 = vrcp.f32 %v761_v7  ;;  %v1310_v7 = vld [vmem:[%s2138_s5] ss:$0 sm:$0xff] }
 0x3da   : > { %v1519_v14 = vpop.eup %1518 }
 0x3db   : > { %v543_v10 = vpop.permute.xlu0 %542  ;;  %v652_v9 = vmul.f32 %v1519_v14, %v1511_v57 }
 0x3dc   : > { %v549_v11 = vsel %vm547_vm3, %v543_v10, 0  ;;  %v1311_v10 = vld [vmem:[%s2139_s6] ss:$0 sm:$0xff] }
 0x3dd   : > { %1360 = vmatpush3.bf16.msra.mxu0 %v549_v11  ;;  %v653_v16 = vpack.c.bf16 %v652_v9, %v652_v9 }
 0x3de   : > { %1371 = vmatprep.subr.bf16.mxu0 %v1695_v0 }
 0x3df   : > { %v877_v22 = vpop.permute.xlu0 %876 }
 0x3e0   : > { %1362 = vmatmul.mubr.msk.bf16.vlgmr.msra.gmra.mrb[4].mxu0 %vm482_vm2, %v541_v13  ;;  %v882_v24 = vsel %vm547_vm3, %v877_v22, 0 }
 0x3e1   : > { %1372 = vmatpush3.bf16.msra.mxu0 %v660_v15  ;;  %1373 = vmatprep.mubr.msk.bf16.mxu0 %vm1696_vm0, %v1695_v0 }
 0x3e2   : > { %1383 = vmatprep.subr.bf16.mxu0 %v1695_v0  ;;  %v1521_v17 = vpop.eup %1520 }
 0x3e3   : > { %v763_v19 = vmul.f32 %v1521_v17, %v1513_v59 }
 0x3e5   : > { %v764_v23 = vpack.c.bf16 %v763_v19, %v763_v19 }
 0x3e8   : > { %1374 = vmatmul.mubr.msk.bf16.vlgmr.msra.gmra.mrb[8].mxu0 %vm482_vm2, %v653_v16 }
 0x3e9   : > { %1385 = vmatprep.mubr.msk.bf16.mxu0 %vm1696_vm0, %v1695_v0 }
 0x404   : > { %v872_v18 = vpop.xlane.xlu1 %871 }
 0x405   : > { %1522 = vrcp.f32 %v872_v18 }
 0x408   : > { %v766_v20 = vpop.permute.xlu1 %765 }
 0x409   : > { %v771_v21 = vsel %vm547_vm3, %v766_v20, 0 }
 0x40a   : > { %1384 = vmatpush3.bf16.msra.mxu0 %v771_v21 }
 0x40b   : > { %1395 = vmatprep.subr.bf16.mxu0 %v1695_v0 }
 0x40d   : > { %1386 = vmatmul.mubr.msk.bf16.vlgmr.msra.gmra.mrb[12].mxu0 %vm482_vm2, %v764_v23 }
 0x40e   : > { %1396 = vmatpush3.bf16.msra.mxu0 %v882_v24  ;;  %1397 = vmatprep.mubr.msk.bf16.mxu0 %vm1696_vm0, %v1695_v0  ;;  %v1711_v24 = vmov 683565275  }
 0x40f   : > { %v1523_v25 = vpop.eup %1522 }
 0x410   : > { %v874_v26 = vmul.f32 %v1523_v25, %v1515_v1 }
 0x412   : > { %v875_v27 = vpack.c.bf16 %v874_v26, %v874_v26  ;;  %v1712_v26 = vmov 2475754826  }
 0x415   : > { %1398 = vmatmul.mubr.msk.bf16.vlgmr.msra.gmra.mrb[16].mxu0 %vm482_vm2, %v875_v27 }
 0x4b3   : > { %v585_v28 = vpop.f32.mrb[4].mxu0 }
 0x4b4   : > { %v1363_v29 = vpop.f32.mrb[5].mxu0 }
 0x4b5   : > { %v588_v30 = vpop.f32.mrb[6].mxu0  ;;  %v1713_v29 = vmov 2131351028  }
 0x4b6   : > { %v1364_v31 = vpop.f32.mrb[7].mxu0 }
 0x4bb   : > { %v696_v32 = vpop.f32.mrb[8].mxu0 }
 0x4bc   : > { %925 = vrot.lane.b32.xlu1 %v696_v32, %s1708_s22  ;;  %v1375_v33 = vpop.f32.mrb[9].mxu0  ;;  %v1714_v32 = vmov 2102212464   ;;  %s1618_s22 = scalar_lea.vmem %s2091_s27, 64 }
 0x4bd   : > { %v699_v34 = vpop.f32.mrb[10].mxu0  ;;  %p1619_p11 = scmp.ne.s32.totalorder %s2091_s27, %s1618_s22 }
 0x4be   : > { %v1376_v35 = vpop.f32.mrb[11].mxu0 }
 0x4bf   : > { %v1715_v35 = vmov 920167782   ;;  %p1620_p1 = pnand %p1619_p11, %p2161_p0 }
 0x4c1   : > { %p1621_p3 = pneg %p1620_p1 }
 0x4e0   : > { %v807_v38 = vpop.f32.mrb[12].mxu0 }
 0x4e1   : > { %929 = vrot.lane.b32.xlu0 %v807_v38, %s1709_s13  ;;  %v1387_v39 = vpop.f32.mrb[13].mxu0  ;;  %v1716_v38 = vmov 1326507024   ;;  %s1624_s13 = scalar_lea.vmem %s1623_s25, 128 }
 0x4e2   : > { %v810_v40 = vpop.f32.mrb[14].mxu0  ;;  %p1626_p9 = scmp.lt.s32.totalorder %s1624_s13, %s1618_s22 }
 0x4e3   : > { %v1388_v41 = vpop.f32.mrb[15].mxu0 }
 0x4e4   : > { %p1627_p12 = por %p1626_p9, %p1625_p7 }
 0x4e6   : > { %p1628_p2 = pnand %p1627_p12, %p1621_p3 }
 0x4e8   : > { %v918_v42 = vpop.f32.mrb[16].mxu0 }
 0x4e9   : > { %933 = vrot.lane.b32.xlu1 %v918_v42, %s1710_s20  ;;  %v1399_v43 = vpop.f32.mrb[17].mxu0 }
 0x4ea   : > { %v921_v44 = vpop.f32.mrb[18].mxu0 }
 0x4eb   : > { %v1400_v45 = vpop.f32.mrb[19].mxu0 }
 0x52e   : > { %v926_v46 = vpop.permute.xlu1 %925 }
 0x52f   : > { %v936_v0 = vsel %vm482_vm2, %v585_v28, %v926_v46 }
 0x553   : > { %v930_v47 = vpop.permute.xlu0 %929 }
 0x554   : > { %v938_v48 = vsel %vm937_vm4, %v936_v0, %v930_v47 }
 0x55b   : > { %v934_v49 = vpop.permute.xlu1 %933 }
 0x55c   : > { %v940_v50 = vsel %vm939_vm5, %v938_v48, %v934_v49 }
 0x55d   : > { %v941_v51 = vpack.c.bf16 %v940_v50, %v940_v50 }
 0x55f   : > { %1406 = vmatmul.mubr.msk.bf16.vlgmr.msra.gmra.mrb[16].mxu1 %vm429_vm1, %v941_v51 }
 0x632   : > { %v997_v54 = vpop.f32.mrb[16].mxu1 }
 0x633   : > { %v998_v55 = vadd.f32 %v1306_v52, %v997_v54  ;;  %v1407_v56 = vpop.f32.mrb[17].mxu1 }
 0x634   : > { %v1000_v57 = vpop.f32.mrb[18].mxu1 }
 0x635   : > { %v1408_v58 = vpop.f32.mrb[19].mxu1  ;;  %v1004_v59 = vadd.f32 %v1003_v53, %v998_v55 }
 0x637   : > { %v1007_v60 = vsel %vm429_vm1, %v1004_v59, 0.0 }
 0x638   : > { %1008 = vadd.xlane.f32.xlu0 %v1007_v60 }
 0x6c5   : > { %v1009_v61 = vpop.xlane.xlu0 %1008 }
 0x6c6   : > { %v1011_v62 = vmul.f32 0.03125, %v1009_v61 }
 0x6c8   : > { %v1012_v63 = vsub.f32 %v1004_v59, %v1011_v62 }
 0x6ca   : > { %v1013_v1 = vmul.f32 %v1012_v63, %v1012_v63 }
 0x6cc   : > { %v1014_v2 = vsel %vm429_vm1, %v1013_v1, 0.0 }
 0x6cd   : > { %1015 = vadd.xlane.f32.xlu1 %v1014_v2 }
 0x75a   : > { %v1016_v4 = vpop.xlane.xlu1 %1015 }
 0x75b   : > { %v1017_v5 = vmul.f32 0.03125, %v1016_v4 }
 0x75d   : > { %v1018_v6 = vadd.f32 1e-05, %v1017_v5 }
 0x75f   : > { %1524 = vrsqrt.f32 %v1018_v6 }
 0x769   : > { %v1525_v3 = vpop.eup %1524 }
 0x76a   : > { %v1020_v8 = vmul.f32 %v1525_v3, %v1012_v63 }
 0x76c   : > { %v1027_v11 = vmul.f32 %v1310_v7, %v1020_v8 }
 0x76e   : > { %v2050_v13 = vadd.f32 %v1311_v10, %v1027_v11 }
 0x770   : > { %v2053_v14 = vadd.f32 %v1312_v12, %v2050_v13 }
 0x772   : > { %v1046_v15 = vand.u32 2139095040, %v2053_v14  ;;  %v1043_v18 = vand.u32 2147483647, %v2053_v14  ;;  %vm1045_vm13 = vcmp.lt.s32.totalorder %v2053_v14, 0  ;;  %vm1135_vm3 = vweird.f32 %v2053_v14 }
 0x774   : > { %v1047_v9 = vshrl.u32 %v1046_v15, 23  ;;  %v1050_v21 = vand.u32 8388607, %v1043_v18  ;;  %vm1044_vm14 = vcmp.le.f32.partialorder %v1043_v18, 0.7853982 }
 0x776   : > { %v1313_v16 = vadd.s32 4294967169, %v1047_v9  ;;  %v1051_v40 = vor.u32 8388608, %v1050_v21 }
 0x778   : > { %v1053_v17 = vadd.s32 1, %v1313_v16  ;;  %v1091_v53 = vshll.u32 %v1051_v40, 8 }
 0x77a   : > { %vm1054_vm6 = vcmp.gt.s32.totalorder %v1053_v17, 0 }
 0x77b   : > { %v1055_v19 = vsel %vm1054_vm6, %v1053_v17, 0 }
 0x77c   : > { %v1057_v20 = vand.u32 31, %v1055_v19  ;;  %v1056_v23 = vshrl.u32 %v1055_v19, 5 }
 0x77e   : > { %v1058_v22 = vsub.s32 32, %v1057_v20  ;;  %v1060_v25 = vshll.u32 %v1711_v24, %v1057_v20  ;;  %v1063_v27 = vshll.u32 %v1712_v26, %v1057_v20  ;;  %v1066_v31 = vshll.u32 %v1713_v29, %v1057_v20 }
 0x77f   : > { %v1069_v34 = vshll.u32 %v1714_v32, %v1057_v20  ;;  %v1072_v37 = vshll.u32 %v1715_v35, %v1057_v20  ;;  %vm1075_vm7 = vcmp.lt.s32.totalorder %v1056_v23, 1  ;;  %vm1078_vm8 = vcmp.lt.s32.totalorder %v1056_v23, 4 }
 0x780   : > { %v1061_v28 = vshrl.u32 %v1712_v26, %v1058_v22  ;;  %v1064_v30 = vshrl.u32 %v1713_v29, %v1058_v22  ;;  %v1067_v33 = vshrl.u32 %v1714_v32, %v1058_v22  ;;  %v1070_v36 = vshrl.u32 %v1715_v35, %v1058_v22 }
 0x781   : > { %v1073_v39 = vshrl.u32 %v1716_v38, %v1058_v22  ;;  %v1059_v48 = vshrl.u32 %v1711_v24, %v1058_v22  ;;  %vm1077_vm9 = vcmp.lt.s32.totalorder %v1056_v23, 3  ;;  %vm1076_vm10 = vcmp.lt.s32.totalorder %v1056_v23, 2 }
 0x782   : > { %v1062_v41 = vor.u32 %v1061_v28, %v1060_v25  ;;  %v1065_v42 = vor.u32 %v1064_v30, %v1063_v27  ;;  %v1068_v43 = vor.u32 %v1067_v33, %v1066_v31  ;;  %v1071_v44 = vor.u32 %v1070_v36, %v1069_v34 }
 0x783   : > { %v1074_v45 = vor.u32 %v1073_v39, %v1072_v37 }
 0x784   : > { %v1080_v46 = vsel %vm1078_vm8, %v1068_v43, 2102212464  ;;  %v1083_v47 = vsel %vm1075_vm7, %v1062_v41, %v1065_v42  ;;  %v1087_v0 = vsel %vm1075_vm7, %v1065_v42, %v1068_v43  ;;  %v1084_v49 = vsel %vm1078_vm8, %v1071_v44, 920167782 }
 0x785   : > { %v1088_v50 = vsel %vm1078_vm8, %v1074_v45, 1326507024  ;;  %v1085_v51 = vsel %vm1077_vm9, %v1068_v43, %v1084_v49  ;;  %v1079_v54 = vsel %vm1075_vm7, %v1059_v48, %v1062_v41  ;;  %v1081_v55 = vsel %vm1077_vm9, %v1065_v42, %v1080_v46 }
 0x786   : > { %v1089_v52 = vsel %vm1077_vm9, %v1071_v44, %v1088_v50  ;;  %v1086_v56 = vsel %vm1076_vm10, %v1083_v47, %v1085_v51  ;;  %v1082_v62 = vsel %vm1076_vm10, %v1079_v54, %v1081_v55 }
 0x787   : > { %v1090_v57 = vsel %vm1076_vm10, %v1087_v0, %v1089_v52  ;;  %v2062_v60 = vmul.u32.u64.low %v1091_v53, %v1086_v56  ;;  %v2063_v61 = vmul.u32.u64.high %v1091_v53, %v1086_v56, %v2062_v60  ;;  %v1098_v1 = vmul.u32 %v1091_v53, %v1082_v62  ;;  %v1318_v52 = vld [vmem:[%s2142_s9] ss:$0 sm:$0xff] }
 0x788   : > { %v2059_v58 = vmul.u32.u64.low %v1091_v53, %v1090_v57  ;;  %v2060_v59 = vmul.u32.u64.high %v1091_v53, %v1090_v57, %v2059_v58 }
 0x789   : > { %v1101_v63 = vadd.s32 1, %v2063_v61 }
 0x78a   : > { %vm1100_vm11 = vc.u32 %v2060_v59, %v2062_v60  ;;  %v1099_v9 = vadd.s32 %v2062_v60, %v2060_v59 }
 0x78b   : > { %v1102_v2 = vsel %vm1100_vm11, %v1101_v63, %v2063_v61 }
 0x78c   : > { %v1103_v4 = vadd.s32 %v1102_v2, %v1098_v1 }
 0x78e   : > { %v1104_v5 = vadd.s32 536870912, %v1103_v4 }
 0x790   : > { %v1105_v6 = vshrl.u32 %v1104_v5, 30 }
 0x792   : > { %v1106_v3 = vshll.u32 %v1105_v6, 30  ;;  %v1129_v30 = vsub.s32 4, %v1105_v6 }
 0x794   : > { %v1107_v7 = vsub.s32 %v1103_v4, %v1106_v3  ;;  %v1130_v32 = vsel %vm1045_vm13, %v1129_v30, %v1105_v6 }
 0x795   : > { %v1132_v33 = vsel %vm1044_vm14, 0, %v1130_v32 }
 0x796   : > { %v1109_v8 = vsub.s32 0, %v1107_v7  ;;  %v1136_v34 = vand.u32 3, %v1132_v33 }
 0x798   : > { %v1314_v10 = vmin.u32 %v1109_v8, %v1107_v7  ;;  %vm1141_vm15 = vcmp.eq.s32.totalorder %v1136_v34, 2  ;;  %vm1138_vm0 = vcmp.eq.s32.totalorder %v1136_v34, 0  ;;  %vm1137_vm2 = vcmp.lt.s32.totalorder %v1136_v34, 2 }
 0x79a   : > { %v1111_v11 = vclz %v1314_v10 }
 0x79c   : > { %v1315_v12 = vadd.s32 4294967294, %v1111_v11 }
 0x79e   : > { %vm1316_vm12 = vcmp.lt.s32.totalorder %v1315_v12, 0 }
 0x79f   : > { %v1114_v15 = vsel %vm1316_vm12, 0, %v1315_v12 }
 0x7a0   : > { %v1115_v16 = vsub.s32 32, %v1114_v15  ;;  %v1119_v17 = vsub.s32 4294967266, %v1114_v15  ;;  %v1116_v19 = vshll.u32 %v1107_v7, %v1114_v15 }
 0x7a2   : > { %v1117_v20 = vshrl.u32 %v1099_v9, %v1115_v16  ;;  %v1120_v21 = vadd.s32 127, %v1119_v17 }
 0x7a4   : > { %v1118_v22 = vor.u32 %v1117_v20, %v1116_v19  ;;  %v1121_v23 = vshll.u32 %v1120_v21, 23 }
 0x7a6   : > { %v1122_v24 = vor.u32 4788187, %v1121_v23  ;;  %v1125_v26 = vcvt.s32.f32 %v1118_v22 }
 0x7a8   : > { %v1123_v25 = vand.u32 2147483647, %v1122_v24 }
 0x7aa   : > { %v1126_v27 = vmul.f32 %v1125_v26, %v1123_v25 }
 0x7ac   : > { %v1127_v28 = vxor.u32 2147483648, %v1126_v27 }
 0x7ae   : > { %v1128_v29 = vsel %vm1045_vm13, %v1127_v28, %v1126_v27 }
 0x7af   : > { %v1131_v31 = vsel %vm1044_vm14, %v2053_v14, %v1128_v29 }
 0x7b0   : > { %1526 = vcosq.f32 %v1131_v31 }
 0x7b1   : > { %1528 = vsinq.f32 %v1131_v31 }
 0x7ba   : > { %v1527_v35 = vpop.eup %1526 }
 0x7bb   : > { %v1529_v36 = vpop.eup %1528  ;;  %v1142_v37 = vxor.u32 2147483648, %v1527_v35 }
 0x7bc   : > { %v1139_v38 = vxor.u32 2147483648, %v1529_v36 }
 0x7bd   : > { %v1143_v39 = vsel %vm1141_vm15, %v1142_v37, %v1529_v36 }
 0x7be   : > { %v1140_v40 = vsel %vm1138_vm0, %v1527_v35, %v1139_v38 }
 0x7bf   : > { %v1144_v18 = vsel %vm1137_vm2, %v1140_v40, %v1143_v39 }
 0x7c0   : > { %v1145_v41 = vsel %vm1135_vm3, nan, %v1144_v18 }
 0x7c1   : > { %v1146_v42 = vadd.f32 %v1145_v41, %v2050_v13  ;;  %v1317_v13 = vld [vmem:[%s2141_s8] ss:$0 sm:$0xff] }
 0x7c3   : > { %v1149_v43 = vsel %vm429_vm1, %v1146_v42, 0.0 }
 0x7c4   : > { %1150 = vadd.xlane.f32.xlu0 %v1149_v43 }
 0x851   : > { %v1151_v44 = vpop.xlane.xlu0 %1150 }
 0x852   : > { %v1152_v45 = vmul.f32 0.03125, %v1151_v44 }
 0x854   : > { %v1153_v46 = vsub.f32 %v1146_v42, %v1152_v45 }
 0x856   : > { %v1154_v47 = vmul.f32 %v1153_v46, %v1153_v46 }
 0x858   : > { %v1155_v0 = vsel %vm429_vm1, %v1154_v47, 0.0  ;;  %vm1177_vm1 = vcmask 257024  }
 0x859   : > { %1156 = vadd.xlane.f32.xlu0 %v1155_v0 }
 0x8e6   : > { %v1157_v48 = vpop.xlane.xlu0 %1156 }
 0x8e7   : > { %v1158_v49 = vmul.f32 0.03125, %v1157_v48 }
 0x8e9   : > { %v1159_v50 = vadd.f32 1e-05, %v1158_v49 }
 0x8eb   : > { %1530 = vrsqrt.f32 %v1159_v50 }
 0x8f5   : > { %v1531_v14 = vpop.eup %1530 }
 0x8f6   : > { %v1161_v51 = vmul.f32 %v1531_v14, %v1153_v46 }
 0x8f8   : > { %v1168_v53 = vmul.f32 %v1317_v13, %v1161_v51 }
 0x8fa   : > { %v1175_v54 = vadd.f32 %v1318_v52, %v1168_v53 }
 0x8fc   : > { %v1176_v55 = vpack.c.bf16 %v1175_v54, %v1175_v54 }
 0x8fe   : > { %1178 = vst.msk [vmem:[%s403_s18] sm:$0xf] %vm1177_vm1, %v1176_v55 }
 0x8ff   : > { %1631 = shalt.err (!%p1628_p2)
}
 0x900   : > { %s1632_s29 = scalar_lea.hbm %s2089_s19, 64  ;;  %s1636_s26 = scalar_lea.hbm %s2143_s10, 128 }
 0x901   : > { %p1633_p13 = scmp.ne.s32.totalorder %s2089_s19, %s1632_s29  ;;  %p1637_p4 = scmp.lt.u32.totalorder %s2089_s19, %s2143_s10 }
 0x902   : > { %p1638_p5 = scmp.lt.u32.totalorder %s1636_s26, %s1632_s29  ;;  %p1640_p11 = scmp.lt.u32.totalorder %s1632_s29, %s2089_s19 }
 0x903   : > { %p1634_p6 = pnand %p1633_p13, %p2161_p0 }
 0x904   : > { %p1639_p8 = por %p1638_p5, %p1637_p4 }
 0x905   : > { %p1635_p10 = pneg %p1634_p6 }
 0x906   : > { %p1641_p1 = por %p1640_p11, %p1639_p8 }
 0x908   : > { %p1642_p3 = pnand %p1641_p1, %p1635_p10 }
 0x90a   : > { %1645 = shalt.err (!%p1642_p3)
}
 0x90b   : > { %1423 = dma.vmem_to_hbm [thread:$0]  (%p2161_p0), %s2091_s27, 64, %s2089_s19, %s1180_s21  }
 0x90c PF: > { %s2162_s12 = sld [smem:[#allocation12_spill]]  ;;  %s2163_s22 = sld [smem:[#allocation13_spill]] }
 0x90d   : > { %p2165_p9 = scmp.ge.s32.totalorder %s1688_s16, 2 }
 0x912   : > { %s1205_s17 = sand.u32 1, %s2162_s12   ;;  %p2164_p7 = scmp.ne.s32.totalorder %s2163_s22, 0 }
 0x913   : > { %s1206_s25 = scalar_lea.sflag [#allocation4], %s1205_s17 }
 0x914   : > { %p1437_p12 = pnand %p2165_p9, %p2164_p7 }
 0x916   : > { %1671 = dma.done.wait (!%p1437_p12), %s1206_s25, 64  }
 0x917   : > { %1673 = vsyncadd (!%p1437_p12), %s1206_s25, 4294967232  ;;  %p24_p2 = scmp.ge.s32.totalorder %s1883_s28, 4   ;;  %s2166_s13 = smov %s1680_s14 }
 0x918   : > { %s2167_s14 = smov %s1684_s15  ;;  %s2168_s15 = smov %s1899_s11 }
 0x919   : > { %s2169_s16 = smov %s1883_s28  ;;  %26 = sbr.rel (!%p24_p2) target bundleno = 6 (0x6), region = 113 }
 0x920   :  { %1211 = vsyncpa [#allocation3], 1 }
 0x921   :  { %1213 = vsyncpa [#allocation3 + $0x1], 1 }
 0x922   :  { %1214 = vsyncpa [#allocation6], 1 }
 0x923   :  { %1215 = vsyncpa [#allocation4], 1 }
 0x924   :  { %1217 = vsyncpa [#allocation4 + $0x1], 1 }

</bundles_post_ra>
